<compile_context>
chip_gen: v5e
topology: v5e:2x2
jax: 0.10.0
libtpu: 0.0.40
codegen_flags: <defaults>
</compile_context>

<pallas_src>
import jax
import jax.numpy as jnp
from jax.experimental import pallas as pl
from jax.experimental.pallas import tpu as pltpu


def _inception_kernel(x_ref, wbt_ref, bb_ref, wf_ref, o_ref):
    # x_ref:   (1, C_in, T)  -- pixels in lanes, input channels in sublanes
    # wbt_ref: (C_pad, C_in) -- concatenated branch 1x1-conv weights, transposed
    # bb_ref:  (C_pad, 1)    -- branch biases (+ 1.0 in the bias-carrier row)
    # wf_ref:  (C_pad, 1)    -- final 1x1 conv weights (+ bf in the bias row)
    # o_ref:   (1, 1, T)
    x = x_ref[0]                                                    # (C_in, T)

    # All branch "pre_forward"s + channel concat fused into one MXU matmul:
    # each branch is a disjoint sublane-row slice of wbt/bb.
    h = jnp.dot(wbt_ref[...], x, preferred_element_type=jnp.float32)  # (C_pad, T)
    h = jnp.maximum(h + bb_ref[...], 0.0)                           # branch ReLU

    # final_conv (C_cat -> 1): VPU broadcast-multiply + sublane reduction.
    # The bias-carrier row (h == 1, weight == bf) adds the final-conv bias.
    y = jnp.sum(h * wf_ref[...], axis=0, keepdims=True)             # (1, T)
    o_ref[0] = y.astype(o_ref.dtype)


def _pick_pixel_tile(hw, c_in, c_pad, *, vmem_budget=8 << 20, max_tile=16384):
    """Largest multiple of 128 dividing hw that fits the VMEM budget."""
    if hw % 128 != 0:
        return hw  # full-dim block is always legal
    # Approx bytes/lane: x double-buffered (2*c_in), out double-buffered (2),
    # h intermediate (+ scaled copy) (2*c_pad), all f32.
    bytes_per_lane = 4 * (2 * c_in + 2 + 2 * c_pad)
    t = min(max_tile, hw, max(128, vmem_budget // bytes_per_lane))
    t = max(128, (t // 128) * 128)
    while hw % t != 0:
        t -= 128
    return t


def inception_block_forward(x_nchw, branch_weights, branch_biases, wf, bf, *,
                            max_tile=16384, vmem_budget=8 << 20):
    """x_nchw: (N, C_in, H, W) float32.  Returns (N, 1, H, W) float32."""
    N, C_in, H, W = x_nchw.shape
    HW = H * W

    # Free reshape: NCHW is already channels-major, so no transpose / HBM pass.
    x_flat = x_nchw.reshape(N, C_in, HW)

    # Concatenate branch params along output-channel axis (== torch.cat(dim=1)).
    wb = jnp.concatenate(branch_weights, axis=1)      # (C_in, C_cat)
    bb = jnp.concatenate(branch_biases, axis=0)       # (C_cat,)
    C_cat = wb.shape[1]
    wf_v = wf.reshape(C_cat)

    # Zero-pad the concat-channel axis to a multiple of 8 sublanes, reserving
    # one extra channel that carries the final-conv bias:
    #   w = 0, b = 1  ->  relu(0*x + 1) = 1,   final weight = bf  -> +bf.
    # Other pad rows contribute exactly 0 (relu(0) * 0).
    C_pad = ((C_cat + 1 + 7) // 8) * 8
    pad = C_pad - C_cat
    wb_p = jnp.pad(wb, ((0, 0), (0, pad)))
    bb_p = jnp.pad(bb, ((0, pad),)).at[C_cat].set(1.0)
    wf_p = jnp.pad(wf_v, ((0, pad),)).at[C_cat].set(bf.reshape(()))

    wbt = jnp.asarray(wb_p.T, jnp.float32)            # (C_pad, C_in)
    bb_col = bb_p.reshape(C_pad, 1).astype(jnp.float32)
    wf_col = wf_p.reshape(C_pad, 1).astype(jnp.float32)

    # Pixel (lane) tile: big, multiple of 128, divides HW, fits VMEM budget.
    t = _pick_pixel_tile(HW, C_in, C_pad, vmem_budget=vmem_budget,
                         max_tile=max_tile)
    assert HW % t == 0

    out = pl.pallas_call(
        _inception_kernel,
        out_shape=jax.ShapeDtypeStruct((N, 1, HW), jnp.float32),
        grid_spec=pltpu.PrefetchScalarGridSpec(
            num_scalar_prefetch=0,
            grid=(N, HW // t),
            in_specs=[
                pl.BlockSpec((1, C_in, t), lambda n, j: (n, 0, j)),
                pl.BlockSpec((C_pad, C_in), lambda n, j: (0, 0)),  # VMEM-resident
                pl.BlockSpec((C_pad, 1), lambda n, j: (0, 0)),     # VMEM-resident
                pl.BlockSpec((C_pad, 1), lambda n, j: (0, 0)),     # VMEM-resident
            ],
            out_specs=pl.BlockSpec((1, 1, t), lambda n, j: (n, 0, j)),
        ),
        compiler_params=pltpu.CompilerParams(
            # Both axes independent -> shard across the 2 TCs on v7x.
            dimension_semantics=("parallel", "parallel"),
        ),
    )(x_flat, wbt, bb_col, wf_col)

    return out.reshape(N, 1, H, W)


def _reference_forward(x_nchw, branch_weights, branch_biases, wf, bf):
    """Pure-JAX reference of the same semantics (sanity check)."""
    N, C_in, H, W = x_nchw.shape
    x_rows = jnp.transpose(x_nchw, (0, 2, 3, 1)).reshape(-1, C_in)
    outs = []
    for w, b in zip(branch_weights, branch_biases):
        outs.append(jnp.maximum(x_rows @ w + b[None], 0.0))
    h = jnp.concatenate(outs, axis=1)
    y = h @ wf.reshape(-1, 1) + bf.reshape(1, 1)
    return jnp.transpose(y.reshape(N, H, W, 1), (0, 3, 1, 2))


if __name__ == "__main__":
    key = jax.random.PRNGKey(0)

    # Small shapes: batch=2, in-channels=4, spatial=16x16,
    # 3 branch "models" each producing 8 channels -> final_channels = 24.
    N, C_in, H, W = 2, 4, 16, 16
    n_branches, C_branch = 3, 8
    C_cat = n_branches * C_branch  # cfg.final_channels

    keys = jax.random.split(key, 2 + 2 * n_branches + 2)
    x = jax.random.normal(keys[0], (N, C_in, H, W), dtype=jnp.float32)

    branch_weights = []
    branch_biases = []
    for i in range(n_branches):
        branch_weights.append(
            0.1 * jax.random.normal(keys[1 + 2 * i], (C_in, C_branch), dtype=jnp.float32)
        )
        branch_biases.append(
            0.05 * jax.random.normal(keys[2 + 2 * i], (C_branch,), dtype=jnp.float32)
        )

    wf = 0.1 * jax.random.normal(keys[-2], (C_cat,), dtype=jnp.float32)  # final_conv weight
    bf = 0.05 * jax.random.normal(keys[-1], (1,), dtype=jnp.float32)     # final_conv bias

    out = inception_block_forward(x, branch_weights, branch_biases, wf, bf)
    out = jax.block_until_ready(out)

    ref = _reference_forward(x, branch_weights, branch_biases, wf, bf)
    assert out.shape == (N, 1, H, W)
    assert jnp.allclose(out, ref, atol=1e-5, rtol=1e-5)

    print("KERNEL_OK")
</pallas_src>

<mosaic_0001>
module attributes {stable_mosaic.version = 11 : i64} {
  func.func @_inception_kernel(%arg0: i32, %arg1: i32, %arg2: memref<1x4x256xf32, #tpu.memory_space<vmem>>, %arg3: memref<32x4xf32, #tpu.memory_space<vmem>>, %arg4: memref<32x1xf32, #tpu.memory_space<vmem>>, %arg5: memref<32x1xf32, #tpu.memory_space<vmem>>, %arg6: memref<1x1x256xf32, #tpu.memory_space<vmem>>) attributes {dimension_semantics = [#tpu.dimension_semantics<parallel>, #tpu.dimension_semantics<parallel>], iteration_bounds = array<i64: 2, 1>, scalar_prefetch = 0 : i64, scratch_operands = 0 : i64, tpu.core_type = #tpu.core_type<tc>, window_params = [{transform_indices = @transform_0, window_bounds = array<i64: 1, 4, 256>}, {pipeline_mode = #tpu.pipeline_mode<synchronous>, transform_indices = @transform_1, window_bounds = array<i64: 32, 4>}, {pipeline_mode = #tpu.pipeline_mode<synchronous>, transform_indices = @transform_2, window_bounds = array<i64: 32, 1>}, {pipeline_mode = #tpu.pipeline_mode<synchronous>, transform_indices = @transform_3, window_bounds = array<i64: 32, 1>}, {transform_indices = @transform_4, window_bounds = array<i64: 1, 1, 256>}]} {
    %c0 = arith.constant 0 : index
    %c0_0 = arith.constant 0 : index
    %c0_1 = arith.constant 0 : index
    %0 = vector.load %arg2[%c0, %c0_0, %c0_1] : memref<1x4x256xf32, #tpu.memory_space<vmem>>, vector<1x4x256xf32>
    %1 = vector.shape_cast %0 : vector<1x4x256xf32> to vector<4x256xf32>
    %c0_2 = arith.constant 0 : index
    %c0_3 = arith.constant 0 : index
    %2 = vector.load %arg3[%c0_2, %c0_3] : memref<32x4xf32, #tpu.memory_space<vmem>>, vector<32x4xf32>
    %cst = arith.constant dense<0.000000e+00> : vector<32x256xf32>
    %3 = tpu.matmul %2, %1, %cst {dimension_numbers = #tpu.dot_dimension_numbers<[1], [0], [0], [1], [0, 0, 1, 1], [], []>} : vector<32x4xf32>, vector<4x256xf32>, vector<32x256xf32> -> vector<32x256xf32>
    %c0_4 = arith.constant 0 : index
    %c0_5 = arith.constant 0 : index
    %4 = vector.load %arg4[%c0_4, %c0_5] : memref<32x1xf32, #tpu.memory_space<vmem>>, vector<32x1xf32>
    %5 = vector.broadcast %4 : vector<32x1xf32> to vector<32x256xf32>
    %6 = arith.addf %3, %5 : vector<32x256xf32>
    %cst_6 = arith.constant 0.000000e+00 : f32
    %7 = vector.broadcast %cst_6 : f32 to vector<32x256xf32>
    %8 = arith.maximumf %6, %7 : vector<32x256xf32>
    %c0_7 = arith.constant 0 : index
    %c0_8 = arith.constant 0 : index
    %9 = vector.load %arg5[%c0_7, %c0_8] : memref<32x1xf32, #tpu.memory_space<vmem>>, vector<32x1xf32>
    %10 = vector.broadcast %9 : vector<32x1xf32> to vector<32x256xf32>
    %11 = arith.mulf %8, %10 : vector<32x256xf32>
    %cst_9 = arith.constant dense<0.000000e+00> : vector<256xf32>
    %12 = vector.multi_reduction <add>, %11, %cst_9 [0] : vector<32x256xf32> to vector<256xf32>
    %13 = vector.shape_cast %12 : vector<256xf32> to vector<1x256xf32>
    %c0_10 = arith.constant 0 : index
    %c0_11 = arith.constant 0 : index
    %c0_12 = arith.constant 0 : index
    %14 = vector.load %arg6[%c0_10, %c0_11, %c0_12] : memref<1x1x256xf32, #tpu.memory_space<vmem>>, vector<1x1x256xf32>
    %15 = vector.shape_cast %14 : vector<1x1x256xf32> to vector<1x256xf32>
    %16 = vector.shape_cast %13 : vector<1x256xf32> to vector<1x1x256xf32>
    tpu.vector_store %arg6[%c0_10, %c0_11, %c0_12], %16 {strides = array<i32>} : memref<1x1x256xf32, #tpu.memory_space<vmem>>, vector<1x1x256xf32>,
    return
  }
  func.func @transform_0(%arg0: i32, %arg1: i32) -> (i32, i32, i32) {
    %c0_i32 = arith.constant 0 : i32
    %c0_i32_0 = arith.constant 0 : i32
    return %arg0, %c0_i32, %arg1 : i32, i32, i32
  }
  func.func @transform_1(%arg0: i32, %arg1: i32) -> (i32, i32) {
    %c0_i32 = arith.constant 0 : i32
    %c0_i32_0 = arith.constant 0 : i32
    %c0_i32_1 = arith.constant 0 : i32
    return %c0_i32, %c0_i32_0 : i32, i32
  }
  func.func @transform_2(%arg0: i32, %arg1: i32) -> (i32, i32) {
    %c0_i32 = arith.constant 0 : i32
    %c0_i32_0 = arith.constant 0 : i32
    %c0_i32_1 = arith.constant 0 : i32
    return %c0_i32, %c0_i32_0 : i32, i32
  }
  func.func @transform_3(%arg0: i32, %arg1: i32) -> (i32, i32) {
    %c0_i32 = arith.constant 0 : i32
    %c0_i32_0 = arith.constant 0 : i32
    %c0_i32_1 = arith.constant 0 : i32
    return %c0_i32, %c0_i32_0 : i32, i32
  }
  func.func @transform_4(%arg0: i32, %arg1: i32) -> (i32, i32, i32) {
    %c0_i32 = arith.constant 0 : i32
    %c0_i32_0 = arith.constant 0 : i32
    return %arg0, %c0_i32, %arg1 : i32, i32, i32
  }
}

</mosaic_0001>

<bundles_post_ra>
// kernel: tpu_custom_call.1
= control target key start
LH: loop header
LB: loop body
LE: loop exit
PB: predicated region body
PF: predicated region fallthrough
CT: control target
= control target key end

     0   :  { %9 = vsyncpa [#allocation3], 0  ;;  %s829_s0 = inlined_call_operand.vmem [shape: f32[2,4,256], index: 0, kind: input, shape index: {}]   ;;  %s830_s1 = inlined_call_operand.vmem [shape: f32[32,4], index: 1, kind: input, shape index: {}]   ;;  %s831_s2 = inlined_call_operand.vmem [shape: f32[32,1], index: 2, kind: input, shape index: {}]   ;;  %s832_s3 = inlined_call_operand.vmem [shape: f32[32,1], index: 3, kind: input, shape index: {}]   ;;  %s833_s4 = inlined_call_operand.hbm [shape: f32[2,1,256], index: 4, kind: output, shape index: {}]  }
   0x1   :  { %11 = vsyncpa [#allocation3 + $0x1], 0  ;;  %s688_s15 = smov 0   ;;  %s690_s16 = smov 0  }
   0x2   :  { %s692_s17 = smov 0   ;;  %s694_s18 = smov 0  }
   0x3   :  { %s696_s19 = smov 0   ;;  %s698_s20 = smov 0  }
   0x4 LB: > { %s498_s21 = sadd.s32 4294967295, %s660_s20   ;;  %s499_s22 = sadd.s32 4294967294, %s660_s20   ;;  %s660_s20 = sphi %s698_s20, %s17_s20   ;;  %s656_s19 = sphi %s696_s19, %s840_s19   ;;  %s652_s18 = sphi %s694_s18, %s839_s18   ;;  %s648_s17 = sphi %s692_s17, %s838_s17   ;;  %s644_s16 = sphi %s690_s16, %s837_s16   ;;  %s640_s15 = sphi %s688_s15, %s836_s15  }
   0x5   : > { %s29_s23 = sadd.s32 1, %s656_s19  ;;  %s129_s24 = sadd.s32 1, %s648_s17 }
   0x6   : > { %p31_p0 = scmp.ge.s32.totalorder %s29_s23, 2  ;;  %p139_p1 = scmp.ne.s32.totalorder %s648_s17, %s644_s16 }
   0x7   : > { %p140_p2 = scmp.eq.s32.totalorder %s498_s21, 1  ;;  %p145_p3 = scmp.ne.s32.totalorder %s644_s16, %s640_s15 }
   0x8   : > { %s842_s23 = smov (%p31_p0, %s29_s23), 0  ;;  %p146_p5 = scmp.eq.s32.totalorder %s499_s22, 1 }
   0x9   : > { %p728_p4 = por %p140_p2, %p139_p1  ;;  %s124_s26 = ssub.s32 %s656_s19, %s842_s23 }
   0xa   : > { %p502_p6 = scmp.ge.s32.totalorder %s660_s20, 1  ;;  %p127_p7 = scmp.eq.s32.totalorder %s124_s26, 0 }
   0xb   : > { %p735_p8 = por %p146_p5, %p145_p3  ;;  %p186_p9 = scmp.lt.s32.totalorder %s660_s20, 3 }
   0xc   : > { %s741_s28 = scalar_select %p127_p7, %s648_s17, %s129_s24  }
   0xd   : > { %p187_p10 = pnand %p502_p6, %p186_p9 }
   0xe   : > { %p217_p11 = scmp.lt.s32.totalorder (!%p187_p10), %s652_s18, 1  ;;  %s213_s22 = sand.u32 (!%p187_p10), 1, %s644_s16  }
   0xf   : > { %190 = sbr.rel (%p187_p10) target bundleno = 202 (0xca), region = 36  ;;  %s503_s24 = sshll.u32 (!%p187_p10), %s213_s22, 1 }
  0x10   : > { %s517_s26 = sshll.u32 (!%p187_p10), %s652_s18, 1  ;;  %s215_s6 = scalar_lea.vmem (!%p187_p10), [#allocation2], %s503_s24 }
  0x11   : > { %s418_s5 = scalar_lea.hbm (!%p187_p10), %s833_s4, %s517_s26 }
  0x12   : > { %s422_s8 = sshll.u32 (!%p187_p10), %s418_s5, 4  ;;  %s423_s8 = int_to_ptr.hbm [resolvable:$true] %s422_s8 }
  0x13   : > { %s596_s9 = sshra.s32 (!%p187_p10), %s423_s8, 4  ;;  %s597_s9 = int_to_ptr.hbm [resolvable:$true] %s596_s9 }
  0x14   : > { %v232_v0 = vld [vmem:[%s831_s2] sm:$0xff]  ;;  %v234_v1 = vld [vmem:[%s831_s2 + $0x10] sm:$0xff]  ;;  %v662_v2 = vmov 0   ;;  %s218_s7 = scalar_select %p217_p11, %s652_s18, 1  ;;  %v233_v5 = vld [vmem:[%s831_s2 + $0x8] sm:$0xff]  ;;  %vm273_vm0 = vcmask 1043456  }
  0x15   : > { %579 = vset.pattern.permute.xlu0 %v662_v2  ;;  %580 = vset.pattern.permute.xlu1 %v662_v2  ;;  %v344_v3 = vld [vmem:[%s832_s3] sm:$0xff]  ;;  %v235_v6 = vld [vmem:[%s831_s2 + $0x18] sm:$0xff]  ;;  %v345_v7 = vld [vmem:[%s832_s3 + $0x8] sm:$0xff]  ;;  %vm260_vm1 = vcmask 31744   ;;  %vm397_vm2 = vcmask 1040384   ;;  %s406_s18 = scalar_lea.sflag [#allocation3], %s213_s22  ;;  %p603_p1 = scmp.lt.s32.totalorder %s597_s9, %s833_s4 }
  0x16   : > { %238 = vperm.xlu0 %579, %v232_v0   ;;  %248 = vperm.xlu1 %580, %v234_v1   ;;  %s520_s10 = sshll.u32 %s218_s7, 3  ;;  %v228_v8 = vld [vmem:[%s830_s1] sm:$0xff]  ;;  %v230_v9 = vld [vmem:[%s830_s1 + $0x10] sm:$0xff]  ;;  %v347_v13 = vld [vmem:[%s832_s3 + $0x18] sm:$0xff]  ;;  %s420_s7 = sshll.u32 %s215_s6, 4  ;;  %s421_s7 = int_to_ptr.vmem [resolvable:$true] %s420_s7 }
  0x17   : > { %581 = vset.pattern.permute.xlu2 %v662_v2  ;;  %s224_s13 = scalar_lea.vmem %s829_s0, %s520_s10  ;;  %v346_v12 = vld [vmem:[%s832_s3 + $0x10] sm:$0xff]  ;;  %v229_v14 = vld [vmem:[%s830_s1 + $0x8] sm:$0xff]  ;;  %v231_v15 = vld [vmem:[%s830_s1 + $0x18] sm:$0xff]  ;;  %s598_s10 = scalar_lea.hbm %s597_s9, 2 }
  0x18   : > { %350 = vperm.xlu2 %581, %v344_v3   ;;  %v227_v4 = vld [vmem:[%s224_s13] sm:$0xff]  ;;  %p599_p12 = scmp.ne.s32.totalorder %s597_s9, %s598_s10  ;;  %s602_s13 = scalar_lea.hbm %s833_s4, 4 }
  0x19   : > { %257 = vst [vmem:[#allocation1] ss:$2 sm:$0xff] %v227_v4  ;;  %p604_p2 = scmp.lt.s32.totalorder %s602_s13, %s598_s10 }
  0x1a   : > { %p600_p13 = pnand %p599_p12, %p728_p4 }
  0x1b   : > { %p605_p3 = por %p604_p2, %p603_p1 }
  0x1c   : > { %p601_p0 = pneg %p600_p13 }
  0x1e   : > { %243 = vperm.xlu0 %579, %v233_v5   ;;  %253 = vperm.xlu1 %580, %v235_v6   ;;  %p606_p5 = pnand %p605_p3, %p601_p0 }
  0x20   : > { %355 = vperm.xlu2 %581, %v345_v7   ;;  %v258_v10 = vld.sshfl [vmem:[#allocation1] sm:$0xff pattern:$0x75316420]  ;;  %v259_v11 = vld.sshfl [vmem:[#allocation1 + $0x8] sm:$0xff pattern:$0x75316420] }
  0x21   : > { %506 = vmatpush.msk.msra.mxu0 %vm273_vm0, %v258_v10  ;;  %521 = vmatpush.msk.msra.mxu2 %vm273_vm0, %v258_v10 }
  0x22   : > { %511 = vmatpush.msk.msra.mxu1 %vm273_vm0, %v259_v11  ;;  %522 = vmatpush.msk.msra.mxu3 %vm273_vm0, %v259_v11 }
  0x23   : > { %507 = vmatmul.msk.f32.vlgmr.msra.gmra.mxu0 %vm260_vm1, %v228_v8  ;;  %509 = vmatmul.msk.f32.vlgmr.msra.gmra.mxu2 %vm260_vm1, %v230_v9 }
  0x24   : > { %512 = vmatmul.msk.f32.vlgmr.msra.gmra.mxu1 %vm260_vm1, %v228_v8  ;;  %514 = vmatmul.msk.f32.vlgmr.msra.gmra.mxu3 %vm260_vm1, %v230_v9  ;;  %v400_v8 = vlaneseq }
  0x26   : > { %360 = vperm.xlu0 %579, %v346_v12   ;;  %365 = vperm.xlu1 %580, %v347_v13   ;;  %vm402_vm3 = vcmp.lt.s32.totalorder %v400_v8, 256 }
  0x2b   : > { %508 = vmatmul.msk.f32.gmra.mxu0 %vm260_vm1, %v229_v14  ;;  %510 = vmatmul.msk.f32.gmra.mxu2 %vm260_vm1, %v231_v15 }
  0x2c   : > { %513 = vmatmul.msk.f32.gmra.mxu1 %vm260_vm1, %v229_v14  ;;  %515 = vmatmul.msk.f32.gmra.mxu3 %vm260_vm1, %v231_v15 }
  0x72   : > { %v351_v20 = vpop.permute.xlu2 %350 }
  0x7a   : > { %v356_v36 = vpop.permute.xlu2 %355 }
  0x88   : > { %v239_v16 = vpop.permute.xlu0 %238  ;;  %v249_v17 = vpop.permute.xlu1 %248 }
  0x90   : > { %v244_v22 = vpop.permute.xlu0 %243  ;;  %v254_v26 = vpop.permute.xlu1 %253 }
  0x98   : > { %v361_v48 = vpop.permute.xlu0 %360  ;;  %v366_v53 = vpop.permute.xlu1 %365 }
  0xa0   : > { %v295_v18 = vpop.f32.mrf.mxu0 }
  0xa1   : > { %v324_v19 = vpop.f32.mrf.mxu1  ;;  %v296_v21 = vadd.f32 %v295_v18, %v239_v16 }
  0xa2   : > { %v325_v23 = vadd.f32 %v324_v19, %v239_v16 }
  0xa3   : > { %v336_v28 = vmax.f32 %v296_v21, 0.0 }
  0xa4   : > { %v337_v32 = vmax.f32 %v325_v23, 0.0 }
  0xa5   : > { %v368_v38 = vmul.f32 %v351_v20, %v336_v28 }
  0xa6   : > { %v301_v24 = vpop.f32.mrf.mxu2  ;;  %v369_v41 = vmul.f32 %v351_v20, %v337_v32 }
  0xa7   : > { %v330_v25 = vpop.f32.mrf.mxu3  ;;  %v302_v29 = vadd.f32 %v301_v24, %v249_v17 }
  0xa8   : > { %v298_v27 = vpop.f32.mrf.mxu0  ;;  %v331_v33 = vadd.f32 %v330_v25, %v249_v17 }
  0xa9   : > { %v299_v30 = vadd.f32 %v298_v27, %v244_v22  ;;  %v327_v31 = vpop.f32.mrf.mxu1  ;;  %v340_v39 = vmax.f32 %v302_v29, 0.0 }
  0xaa   : > { %v328_v34 = vadd.f32 %v327_v31, %v244_v22  ;;  %v341_v42 = vmax.f32 %v331_v33, 0.0 }
  0xab   : > { %v338_v35 = vmax.f32 %v299_v30, 0.0  ;;  %v372_v51 = vmul.f32 %v361_v48, %v340_v39 }
  0xac   : > { %v339_v37 = vmax.f32 %v328_v34, 0.0  ;;  %v373_v54 = vmul.f32 %v361_v48, %v341_v42 }
  0xad   : > { %v370_v40 = vmul.f32 %v356_v36, %v338_v35 }
  0xae   : > { %v371_v43 = vmul.f32 %v356_v36, %v339_v37  ;;  %v304_v44 = vpop.f32.mrf.mxu2 }
  0xaf   : > { %v376_v45 = vadd.f32 %v370_v40, %v368_v38  ;;  %v305_v46 = vadd.f32 %v304_v44, %v254_v26  ;;  %v333_v47 = vpop.f32.mrf.mxu3 }
  0xb0   : > { %v385_v49 = vadd.f32 %v371_v43, %v369_v41  ;;  %v334_v50 = vadd.f32 %v333_v47, %v254_v26 }
  0xb1   : > { %v342_v52 = vmax.f32 %v305_v46, 0.0  ;;  %v377_v57 = vadd.f32 %v376_v45, %v372_v51 }
  0xb2   : > { %v343_v55 = vmax.f32 %v334_v50, 0.0  ;;  %v386_v59 = vadd.f32 %v385_v49, %v373_v54 }
  0xb3   : > { %v374_v56 = vmul.f32 %v366_v53, %v342_v52 }
  0xb4   : > { %v375_v58 = vmul.f32 %v366_v53, %v343_v55 }
  0xb5   : > { %v378_v60 = vadd.f32 %v377_v57, %v374_v56 }
  0xb6   : > { %v387_v61 = vadd.f32 %v386_v59, %v375_v58 }
  0xb7   : > { %v379_v62 = vrot.slane %v378_v60, 4 }
  0xb8   : > { %v388_v63 = vrot.slane %v387_v61, 4 }
  0xb9   : > { %v380_v0 = vadd.f32 %v379_v62, %v378_v60 }
  0xba   : > { %v389_v1 = vadd.f32 %v388_v63, %v387_v61 }
  0xbb   : > { %v381_v2 = vrot.slane %v380_v0, 2 }
  0xbc   : > { %v390_v3 = vrot.slane %v389_v1, 2 }
  0xbd   : > { %v382_v4 = vadd.f32 %v381_v2, %v380_v0 }
  0xbe   : > { %v391_v5 = vadd.f32 %v390_v3, %v389_v1 }
  0xbf   : > { %v383_v6 = vrot.slane %v382_v4, 1 }
  0xc0   : > { %v392_v7 = vrot.slane %v391_v5, 1 }
  0xc1   : > { %v384_v10 = vadd.f32 %v383_v6, %v382_v4 }
  0xc2   : > { %v393_v9 = vadd.f32 %v392_v7, %v391_v5 }
  0xc4   : > { %v396_v11 = vrot.slane %v393_v9, 7 }
  0xc6   : > { %v398_v12 = vsel %vm397_vm2, %v384_v10, %v396_v11 }
  0xc7   : > { %404 = vst.msk [vmem:[%s215_s6] sm:$0x3] %vm402_vm3, %v398_v12 }
  0xc8   : > { %609 = shalt.err (!%p606_p5)
}
  0xc9   : > { %523 = dma.vmem_to_hbm [thread:$0]  (%p728_p4), %s421_s7, 32, %s423_s8, %s406_s18  }
  0xca PF: > { %p529_p6 = scmp.ge.s32.totalorder %s660_s20, 2  ;;  %s434_s22 = sand.u32 1, %s640_s15  }
  0xcb   : > { %s435_s24 = scalar_lea.sflag [#allocation3], %s434_s22 }
  0xcc   : > { %p526_p7 = pnand %p529_p6, %p735_p8 }
  0xce   : > { %p527_p9 = pneg %p526_p7 }
  0xd0   : > { %635 = dma.done.wait (%p527_p9), %s435_s24, 32  }
  0xd1   : > { %637 = vsyncadd (%p527_p9), %s435_s24, 4294967264  ;;  %s17_s20 = sadd.s32 1, %s660_s20   ;;  %s836_s15 = smov %s644_s16 }
  0xd2   : > { %p14_p10 = scmp.ge.s32.totalorder %s17_s20, 4   ;;  %s837_s16 = smov %s648_s17 }
  0xd3   : > { %s838_s17 = smov %s741_s28  ;;  %s839_s18 = smov %s656_s19 }
  0xd4   : > { %s840_s19 = smov %s842_s23  ;;  %16 = sbr.rel (!%p14_p10) target bundleno = 4 (0x4), region = 71 }
  0xd9   :  { %441 = vsyncpa [#allocation3], 1 }
  0xda   :  { %443 = vsyncpa [#allocation3 + $0x1], 1 }

</bundles_post_ra>
